<compile_context>
chip_gen: v6e
topology: v6e:2x2x1
jax: 0.10.0
libtpu: 0.0.40
codegen_flags: <defaults>
</compile_context>

<pallas_src>
import jax
import jax.numpy as jnp
from jax.experimental import pallas as pl
from jax.experimental.pallas import tpu as pltpu


# ----------------------------- Pallas kernel -------------------------------

def _fip_forward_kernel(w_ref, s_ref, h_ref, o_ref):
    # w_ref: SMEM (nb,) f32     Lambdas linear weight (scalar prefetch)
    # s_ref: (2, nb, 8, tn)     stacked [s0; s1] stats, samples on sublanes+lanes
    # h_ref: (8, tn) f32        h(y=1|x)
    # o_ref: (8, tn) f32        output probabilities
    nb = s_ref.shape[1]

    # Projection s @ lambda as an unrolled scalar * (8, tn) slab accumulation:
    # scalars broadcast for free from sreg, full-vreg VPU work, no MXU/XLU.
    w0 = w_ref[0]
    l0 = w0 * s_ref[0, 0].astype(jnp.float32)
    l1 = w0 * s_ref[1, 0].astype(jnp.float32)
    for j in range(1, nb):
        wj = w_ref[j]
        l0 = l0 + wj * s_ref[0, j].astype(jnp.float32)
        l1 = l1 + wj * s_ref[1, j].astype(jnp.float32)

    e0 = jnp.exp(l0)                       # EUP, full (8,128) vregs
    e1 = jnp.exp(l1)
    h = h_ref[...]
    nom = h * e1
    z = (1.0 - h) * e0 + nom               # > 0 always (exp > 0, h in [0,1])
    # TODO(synk): if a bundle dump ever shows the single v5e EUP as the binding
    # slot, fold e0/e1 into one exp(l0 - l1) and compute 1/(1 + (1-h)*r/h).
    o_ref[...] = nom / z


def _round_up(n, m):
    return ((n + m - 1) // m) * m


def _pick_lane_tile(lanes, max_tile=8192, split_min=4096):
    """Lane-tile size for the (8, lanes) sample layout."""
    if lanes % 128 != 0:
        # small problem: a single full-extent tile (last block dim == array dim)
        return lanes
    best = 128
    t = 128
    while t <= min(lanes, max_tile):
        if lanes % t == 0:
            best = t
        t += 128
    # Only split a single-step grid in two when each shard is still large
    # (>= split_min lanes = 8*split_min samples): feeds both v7x TensorCores
    # while keeping the 0.35us/step pipeline overhead negligible; harmless on
    # single-TC v5e/v6e because the split only happens for big problems.
    if best == lanes and lanes >= 2 * split_min and (lanes // 2) % 128 == 0:
        best = lanes // 2
    return best


def fip_forward(h, s, w, *, max_lane_tile=8192):
    """FairIProjection.forward.

    h: [N] float       h(y=1|x)
    s: [2, nb, 8, L]   stacked (s0, s1) statistics in kernel layout, sample n
                       lives at (sublane n // L, lane n % L); bf16 or f32.
    w: [nb] float      Lambdas linear weight.
    Returns probs [N] float32.
    """
    two, nb, eight, lanes = s.shape
    assert two == 2 and eight == 8
    N = h.shape[0]
    n_pad = 8 * lanes
    assert N <= n_pad, "stats layout must cover all samples"

    # h / output are tiny (4 B/sample); reshape [8*L] -> (8, L) is contiguous.
    h2 = jnp.pad(h.astype(jnp.float32), (0, n_pad - N)).reshape(8, lanes)
    w1 = w.astype(jnp.float32).reshape(nb)

    tn = _pick_lane_tile(lanes, max_lane_tile)
    grid = (lanes // tn,)

    out = pl.pallas_call(
        _fip_forward_kernel,
        out_shape=jax.ShapeDtypeStruct((8, lanes), jnp.float32),
        grid_spec=pltpu.PrefetchScalarGridSpec(
            num_scalar_prefetch=1,              # lambda weights -> SMEM
            grid=grid,
            in_specs=[
                pl.BlockSpec((2, nb, 8, tn), lambda i, w_ref: (0, 0, 0, i)),
                pl.BlockSpec((8, tn), lambda i, w_ref: (0, i)),
            ],
            out_specs=pl.BlockSpec((8, tn), lambda i, w_ref: (0, i)),
        ),
        compiler_params=pltpu.CompilerParams(
            dimension_semantics=("parallel",)),
    )(w1, s, h2)
    return out.reshape(-1)[:N]


# --------------------- synthetic FairnessNotion (glue) ---------------------

def _stat_func_kernel_layout(groups_2d, y, nb, dtype):
    """Demographic-parity-style statistics phi_g(x, y) = y * (1[group==g] - 1/nb),
    emitted directly in the (nb, 8, L) kernel layout (no post-hoc relayout)."""
    g = groups_2d[None, :, :]                                    # (1, 8, L)
    idx = jnp.arange(nb, dtype=groups_2d.dtype)[:, None, None]   # (nb, 1, 1)
    onehot = (g == idx).astype(jnp.float32)                      # (nb, 8, L)
    return (jnp.float32(y) * (onehot - 1.0 / nb)).astype(dtype)


def build_stats_kernel_layout(groups, nb, *, dtype=jnp.bfloat16):
    """Build stacked (2, nb, 8, L) statistics for the kernel.

    bf16 is exact for one-hot-style statistics; pass dtype=jnp.float32 for
    arbitrary FairnessNotion statistics that need full precision (the kernel
    upcasts either way)."""
    N = groups.shape[0]
    lanes = pl.cdiv(N, 8)
    if lanes >= 128:
        lanes = _round_up(lanes, 128)       # clean lane tiling for large N
    n_pad = 8 * lanes
    g2 = jnp.pad(groups, (0, n_pad - N)).reshape(8, lanes)
    s0 = _stat_func_kernel_layout(g2, 0, nb, dtype)
    s1 = _stat_func_kernel_layout(g2, 1, nb, dtype)
    return jnp.stack([s0, s1]), n_pad
    # TODO(synk): generic FairnessNotion implementations that only produce
    # [N, nb] stats would need either a producer-side layout change or an
    # in-kernel (8,128) tile transpose on the otherwise-idle XLU.


# --------------------------------- main -------------------------------------

if __name__ == "__main__":
    N, nb, d = 512, 8, 4   # samples, nb_constraints, extra feature dims (unused by stat)

    key = jax.random.PRNGKey(0)
    k_h, k_grp, k_lbl, k_w, k_x = jax.random.split(key, 5)

    # inputs consistent with the module's forward(h, x, labels)
    x_feat = jax.random.normal(k_x, (N, d), dtype=jnp.float32)           # unused features
    groups = jax.random.randint(k_grp, (N,), 0, nb)                      # sensitive attribute
    labels = jax.random.randint(k_lbl, (N,), 0, 2).astype(jnp.float32)   # binary labels
    h = jax.nn.sigmoid(jax.random.normal(k_h, (N,), dtype=jnp.float32))  # h(y=1|x)

    # Lambdas linear weight, PyTorch-style uniform(-1/sqrt(nb), 1/sqrt(nb)), deterministic.
    bound = 1.0 / jnp.sqrt(jnp.float32(nb))
    lam_w = jax.random.uniform(k_w, (nb,), minval=-bound, maxval=bound, dtype=jnp.float32)

    # statistics for y=0 / y=1, produced directly in kernel layout (bf16, exact here)
    s_packed, _ = build_stats_kernel_layout(groups, nb, dtype=jnp.bfloat16)

    probs = fip_forward(h, s_packed, lam_w)
    probs = jax.block_until_ready(probs)

    # pure-JAX reference of FairIProjection.forward (classic [N, nb] stat layout)
    onehot = jax.nn.one_hot(groups, nb, dtype=jnp.float32)
    s0_ref = 0.0 * (onehot - 1.0 / nb)
    s1_ref = 1.0 * (onehot - 1.0 / nb)
    e0_ref = jnp.exp(s0_ref @ lam_w)
    e1_ref = jnp.exp(s1_ref @ lam_w)
    z_ref = (1.0 - h) * e0_ref + h * e1_ref
    probs_ref = h * e1_ref / z_ref

    assert probs.shape == (N,)
    assert jnp.allclose(probs, probs_ref, atol=1e-4, rtol=1e-4), (
        f"max err {jnp.max(jnp.abs(probs - probs_ref))}")

    # TODO(synk): fit()/LBFGS optimization loop and the sparse-input shortcut in
    # Lambdas.forward are host/training logic, not part of the forward kernel.
    print("KERNEL_OK")
</pallas_src>

<mosaic_0001>
module attributes {stable_mosaic.version = 11 : i64} {
  func.func @_fip_forward_kernel(%arg0: i32, %arg1: memref<8xf32, #tpu.memory_space<smem>>, %arg2: memref<2x8x8x64xbf16, #tpu.memory_space<vmem>>, %arg3: memref<8x64xf32, #tpu.memory_space<vmem>>, %arg4: memref<8x64xf32, #tpu.memory_space<vmem>>) attributes {dimension_semantics = [#tpu.dimension_semantics<parallel>], iteration_bounds = array<i64: 1>, scalar_prefetch = 1 : i64, scratch_operands = 0 : i64, tpu.core_type = #tpu.core_type<tc>, window_params = [{transform_indices = @transform_0, window_bounds = array<i64: 2, 8, 8, 64>}, {transform_indices = @transform_1, window_bounds = array<i64: 8, 64>}, {transform_indices = @transform_2, window_bounds = array<i64: 8, 64>}]} {
    %c0 = arith.constant 0 : index
    %0 = memref.load %arg1[%c0] : memref<8xf32, #tpu.memory_space<smem>>
    %c0_0 = arith.constant 0 : index
    %c0_1 = arith.constant 0 : index
    %c0_2 = arith.constant 0 : index
    %c0_3 = arith.constant 0 : index
    %1 = vector.load %arg2[%c0_0, %c0_1, %c0_2, %c0_3] : memref<2x8x8x64xbf16, #tpu.memory_space<vmem>>, vector<1x1x8x64xbf16>
    %2 = vector.shape_cast %1 : vector<1x1x8x64xbf16> to vector<8x64xbf16>
    %3 = arith.extf %2 : vector<8x64xbf16> to vector<8x64xf32>
    %4 = vector.broadcast %0 : f32 to vector<8x64xf32>
    %5 = arith.mulf %4, %3 : vector<8x64xf32>
    %c1 = arith.constant 1 : index
    %c0_4 = arith.constant 0 : index
    %c0_5 = arith.constant 0 : index
    %c0_6 = arith.constant 0 : index
    %6 = vector.load %arg2[%c1, %c0_4, %c0_5, %c0_6] : memref<2x8x8x64xbf16, #tpu.memory_space<vmem>>, vector<1x1x8x64xbf16>
    %7 = vector.shape_cast %6 : vector<1x1x8x64xbf16> to vector<8x64xbf16>
    %8 = arith.extf %7 : vector<8x64xbf16> to vector<8x64xf32>
    %9 = vector.broadcast %0 : f32 to vector<8x64xf32>
    %10 = arith.mulf %9, %8 : vector<8x64xf32>
    %c1_7 = arith.constant 1 : index
    %11 = memref.load %arg1[%c1_7] : memref<8xf32, #tpu.memory_space<smem>>
    %c0_8 = arith.constant 0 : index
    %c1_9 = arith.constant 1 : index
    %c0_10 = arith.constant 0 : index
    %c0_11 = arith.constant 0 : index
    %12 = vector.load %arg2[%c0_8, %c1_9, %c0_10, %c0_11] : memref<2x8x8x64xbf16, #tpu.memory_space<vmem>>, vector<1x1x8x64xbf16>
    %13 = vector.shape_cast %12 : vector<1x1x8x64xbf16> to vector<8x64xbf16>
    %14 = arith.extf %13 : vector<8x64xbf16> to vector<8x64xf32>
    %15 = vector.broadcast %11 : f32 to vector<8x64xf32>
    %16 = arith.mulf %15, %14 : vector<8x64xf32>
    %17 = arith.addf %5, %16 : vector<8x64xf32>
    %c1_12 = arith.constant 1 : index
    %c1_13 = arith.constant 1 : index
    %c0_14 = arith.constant 0 : index
    %c0_15 = arith.constant 0 : index
    %18 = vector.load %arg2[%c1_12, %c1_13, %c0_14, %c0_15] : memref<2x8x8x64xbf16, #tpu.memory_space<vmem>>, vector<1x1x8x64xbf16>
    %19 = vector.shape_cast %18 : vector<1x1x8x64xbf16> to vector<8x64xbf16>
    %20 = arith.extf %19 : vector<8x64xbf16> to vector<8x64xf32>
    %21 = vector.broadcast %11 : f32 to vector<8x64xf32>
    %22 = arith.mulf %21, %20 : vector<8x64xf32>
    %23 = arith.addf %10, %22 : vector<8x64xf32>
    %c2 = arith.constant 2 : index
    %24 = memref.load %arg1[%c2] : memref<8xf32, #tpu.memory_space<smem>>
    %c0_16 = arith.constant 0 : index
    %c2_17 = arith.constant 2 : index
    %c0_18 = arith.constant 0 : index
    %c0_19 = arith.constant 0 : index
    %25 = vector.load %arg2[%c0_16, %c2_17, %c0_18, %c0_19] : memref<2x8x8x64xbf16, #tpu.memory_space<vmem>>, vector<1x1x8x64xbf16>
    %26 = vector.shape_cast %25 : vector<1x1x8x64xbf16> to vector<8x64xbf16>
    %27 = arith.extf %26 : vector<8x64xbf16> to vector<8x64xf32>
    %28 = vector.broadcast %24 : f32 to vector<8x64xf32>
    %29 = arith.mulf %28, %27 : vector<8x64xf32>
    %30 = arith.addf %17, %29 : vector<8x64xf32>
    %c1_20 = arith.constant 1 : index
    %c2_21 = arith.constant 2 : index
    %c0_22 = arith.constant 0 : index
    %c0_23 = arith.constant 0 : index
    %31 = vector.load %arg2[%c1_20, %c2_21, %c0_22, %c0_23] : memref<2x8x8x64xbf16, #tpu.memory_space<vmem>>, vector<1x1x8x64xbf16>
    %32 = vector.shape_cast %31 : vector<1x1x8x64xbf16> to vector<8x64xbf16>
    %33 = arith.extf %32 : vector<8x64xbf16> to vector<8x64xf32>
    %34 = vector.broadcast %24 : f32 to vector<8x64xf32>
    %35 = arith.mulf %34, %33 : vector<8x64xf32>
    %36 = arith.addf %23, %35 : vector<8x64xf32>
    %c3 = arith.constant 3 : index
    %37 = memref.load %arg1[%c3] : memref<8xf32, #tpu.memory_space<smem>>
    %c0_24 = arith.constant 0 : index
    %c3_25 = arith.constant 3 : index
    %c0_26 = arith.constant 0 : index
    %c0_27 = arith.constant 0 : index
    %38 = vector.load %arg2[%c0_24, %c3_25, %c0_26, %c0_27] : memref<2x8x8x64xbf16, #tpu.memory_space<vmem>>, vector<1x1x8x64xbf16>
    %39 = vector.shape_cast %38 : vector<1x1x8x64xbf16> to vector<8x64xbf16>
    %40 = arith.extf %39 : vector<8x64xbf16> to vector<8x64xf32>
    %41 = vector.broadcast %37 : f32 to vector<8x64xf32>
    %42 = arith.mulf %41, %40 : vector<8x64xf32>
    %43 = arith.addf %30, %42 : vector<8x64xf32>
    %c1_28 = arith.constant 1 : index
    %c3_29 = arith.constant 3 : index
    %c0_30 = arith.constant 0 : index
    %c0_31 = arith.constant 0 : index
    %44 = vector.load %arg2[%c1_28, %c3_29, %c0_30, %c0_31] : memref<2x8x8x64xbf16, #tpu.memory_space<vmem>>, vector<1x1x8x64xbf16>
    %45 = vector.shape_cast %44 : vector<1x1x8x64xbf16> to vector<8x64xbf16>
    %46 = arith.extf %45 : vector<8x64xbf16> to vector<8x64xf32>
    %47 = vector.broadcast %37 : f32 to vector<8x64xf32>
    %48 = arith.mulf %47, %46 : vector<8x64xf32>
    %49 = arith.addf %36, %48 : vector<8x64xf32>
    %c4 = arith.constant 4 : index
    %50 = memref.load %arg1[%c4] : memref<8xf32, #tpu.memory_space<smem>>
    %c0_32 = arith.constant 0 : index
    %c4_33 = arith.constant 4 : index
    %c0_34 = arith.constant 0 : index
    %c0_35 = arith.constant 0 : index
    %51 = vector.load %arg2[%c0_32, %c4_33, %c0_34, %c0_35] : memref<2x8x8x64xbf16, #tpu.memory_space<vmem>>, vector<1x1x8x64xbf16>
    %52 = vector.shape_cast %51 : vector<1x1x8x64xbf16> to vector<8x64xbf16>
    %53 = arith.extf %52 : vector<8x64xbf16> to vector<8x64xf32>
    %54 = vector.broadcast %50 : f32 to vector<8x64xf32>
    %55 = arith.mulf %54, %53 : vector<8x64xf32>
    %56 = arith.addf %43, %55 : vector<8x64xf32>
    %c1_36 = arith.constant 1 : index
    %c4_37 = arith.constant 4 : index
    %c0_38 = arith.constant 0 : index
    %c0_39 = arith.constant 0 : index
    %57 = vector.load %arg2[%c1_36, %c4_37, %c0_38, %c0_39] : memref<2x8x8x64xbf16, #tpu.memory_space<vmem>>, vector<1x1x8x64xbf16>
    %58 = vector.shape_cast %57 : vector<1x1x8x64xbf16> to vector<8x64xbf16>
    %59 = arith.extf %58 : vector<8x64xbf16> to vector<8x64xf32>
    %60 = vector.broadcast %50 : f32 to vector<8x64xf32>
    %61 = arith.mulf %60, %59 : vector<8x64xf32>
    %62 = arith.addf %49, %61 : vector<8x64xf32>
    %c5 = arith.constant 5 : index
    %63 = memref.load %arg1[%c5] : memref<8xf32, #tpu.memory_space<smem>>
    %c0_40 = arith.constant 0 : index
    %c5_41 = arith.constant 5 : index
    %c0_42 = arith.constant 0 : index
    %c0_43 = arith.constant 0 : index
    %64 = vector.load %arg2[%c0_40, %c5_41, %c0_42, %c0_43] : memref<2x8x8x64xbf16, #tpu.memory_space<vmem>>, vector<1x1x8x64xbf16>
    %65 = vector.shape_cast %64 : vector<1x1x8x64xbf16> to vector<8x64xbf16>
    %66 = arith.extf %65 : vector<8x64xbf16> to vector<8x64xf32>
    %67 = vector.broadcast %63 : f32 to vector<8x64xf32>
    %68 = arith.mulf %67, %66 : vector<8x64xf32>
    %69 = arith.addf %56, %68 : vector<8x64xf32>
    %c1_44 = arith.constant 1 : index
    %c5_45 = arith.constant 5 : index
    %c0_46 = arith.constant 0 : index
    %c0_47 = arith.constant 0 : index
    %70 = vector.load %arg2[%c1_44, %c5_45, %c0_46, %c0_47] : memref<2x8x8x64xbf16, #tpu.memory_space<vmem>>, vector<1x1x8x64xbf16>
    %71 = vector.shape_cast %70 : vector<1x1x8x64xbf16> to vector<8x64xbf16>
    %72 = arith.extf %71 : vector<8x64xbf16> to vector<8x64xf32>
    %73 = vector.broadcast %63 : f32 to vector<8x64xf32>
    %74 = arith.mulf %73, %72 : vector<8x64xf32>
    %75 = arith.addf %62, %74 : vector<8x64xf32>
    %c6 = arith.constant 6 : index
    %76 = memref.load %arg1[%c6] : memref<8xf32, #tpu.memory_space<smem>>
    %c0_48 = arith.constant 0 : index
    %c6_49 = arith.constant 6 : index
    %c0_50 = arith.constant 0 : index
    %c0_51 = arith.constant 0 : index
    %77 = vector.load %arg2[%c0_48, %c6_49, %c0_50, %c0_51] : memref<2x8x8x64xbf16, #tpu.memory_space<vmem>>, vector<1x1x8x64xbf16>
    %78 = vector.shape_cast %77 : vector<1x1x8x64xbf16> to vector<8x64xbf16>
    %79 = arith.extf %78 : vector<8x64xbf16> to vector<8x64xf32>
    %80 = vector.broadcast %76 : f32 to vector<8x64xf32>
    %81 = arith.mulf %80, %79 : vector<8x64xf32>
    %82 = arith.addf %69, %81 : vector<8x64xf32>
    %c1_52 = arith.constant 1 : index
    %c6_53 = arith.constant 6 : index
    %c0_54 = arith.constant 0 : index
    %c0_55 = arith.constant 0 : index
    %83 = vector.load %arg2[%c1_52, %c6_53, %c0_54, %c0_55] : memref<2x8x8x64xbf16, #tpu.memory_space<vmem>>, vector<1x1x8x64xbf16>
    %84 = vector.shape_cast %83 : vector<1x1x8x64xbf16> to vector<8x64xbf16>
    %85 = arith.extf %84 : vector<8x64xbf16> to vector<8x64xf32>
    %86 = vector.broadcast %76 : f32 to vector<8x64xf32>
    %87 = arith.mulf %86, %85 : vector<8x64xf32>
    %88 = arith.addf %75, %87 : vector<8x64xf32>
    %c7 = arith.constant 7 : index
    %89 = memref.load %arg1[%c7] : memref<8xf32, #tpu.memory_space<smem>>
    %c0_56 = arith.constant 0 : index
    %c7_57 = arith.constant 7 : index
    %c0_58 = arith.constant 0 : index
    %c0_59 = arith.constant 0 : index
    %90 = vector.load %arg2[%c0_56, %c7_57, %c0_58, %c0_59] : memref<2x8x8x64xbf16, #tpu.memory_space<vmem>>, vector<1x1x8x64xbf16>
    %91 = vector.shape_cast %90 : vector<1x1x8x64xbf16> to vector<8x64xbf16>
    %92 = arith.extf %91 : vector<8x64xbf16> to vector<8x64xf32>
    %93 = vector.broadcast %89 : f32 to vector<8x64xf32>
    %94 = arith.mulf %93, %92 : vector<8x64xf32>
    %95 = arith.addf %82, %94 : vector<8x64xf32>
    %c1_60 = arith.constant 1 : index
    %c7_61 = arith.constant 7 : index
    %c0_62 = arith.constant 0 : index
    %c0_63 = arith.constant 0 : index
    %96 = vector.load %arg2[%c1_60, %c7_61, %c0_62, %c0_63] : memref<2x8x8x64xbf16, #tpu.memory_space<vmem>>, vector<1x1x8x64xbf16>
    %97 = vector.shape_cast %96 : vector<1x1x8x64xbf16> to vector<8x64xbf16>
    %98 = arith.extf %97 : vector<8x64xbf16> to vector<8x64xf32>
    %99 = vector.broadcast %89 : f32 to vector<8x64xf32>
    %100 = arith.mulf %99, %98 : vector<8x64xf32>
    %101 = arith.addf %88, %100 : vector<8x64xf32>
    %102 = math.exp %95 : vector<8x64xf32>
    %103 = math.exp %101 : vector<8x64xf32>
    %c0_64 = arith.constant 0 : index
    %c0_65 = arith.constant 0 : index
    %104 = vector.load %arg3[%c0_64, %c0_65] : memref<8x64xf32, #tpu.memory_space<vmem>>, vector<8x64xf32>
    %105 = arith.mulf %104, %103 : vector<8x64xf32>
    %cst = arith.constant 1.000000e+00 : f32
    %106 = vector.broadcast %cst : f32 to vector<8x64xf32>
    %107 = arith.subf %106, %104 : vector<8x64xf32>
    %108 = arith.mulf %107, %102 : vector<8x64xf32>
    %109 = arith.addf %108, %105 : vector<8x64xf32>
    %110 = arith.divf %105, %109 : vector<8x64xf32>
    %c0_66 = arith.constant 0 : index
    %c0_67 = arith.constant 0 : index
    %111 = vector.load %arg4[%c0_66, %c0_67] : memref<8x64xf32, #tpu.memory_space<vmem>>, vector<8x64xf32>
    tpu.vector_store %arg4[%c0_66, %c0_67], %110 {strides = array<i32>} : memref<8x64xf32, #tpu.memory_space<vmem>>, vector<8x64xf32>,
    return
  }
  func.func @transform_0(%arg0: i32, %arg1: memref<8xf32, #tpu.memory_space<smem>>) -> (i32, i32, i32, i32) {
    %c0_i32 = arith.constant 0 : i32
    %c0_i32_0 = arith.constant 0 : i32
    %c0_i32_1 = arith.constant 0 : i32
    %c0_i32_2 = arith.constant 0 : i32
    return %c0_i32, %c0_i32_0, %c0_i32_1, %arg0 : i32, i32, i32, i32
  }
  func.func @transform_1(%arg0: i32, %arg1: memref<8xf32, #tpu.memory_space<smem>>) -> (i32, i32) {
    %c0_i32 = arith.constant 0 : i32
    %c0_i32_0 = arith.constant 0 : i32
    return %c0_i32, %arg0 : i32, i32
  }
  func.func @transform_2(%arg0: i32, %arg1: memref<8xf32, #tpu.memory_space<smem>>) -> (i32, i32) {
    %c0_i32 = arith.constant 0 : i32
    %c0_i32_0 = arith.constant 0 : i32
    return %c0_i32, %arg0 : i32, i32
  }
}

</mosaic_0001>

<bundles_post_ra>
// kernel: tpu_custom_call.1
= control target key start
LH: loop header
LB: loop body
LE: loop exit
PB: predicated region body
PF: predicated region fallthrough
CT: control target
= control target key end

     0   :  { %s260_s12 = smov [#allocation3]   ;;  %s313_s0 = inlined_call_operand.hbm [shape: f32[8], index: 0, kind: input, shape index: {}]   ;;  %s314_s1 = inlined_call_operand.hbm [shape: bf16[2,8,8,64], index: 1, kind: input, shape index: {}]   ;;  %s315_s2 = inlined_call_operand.hbm [shape: f32[8,64], index: 2, kind: input, shape index: {}]   ;;  %s316_s3 = inlined_call_operand.hbm [shape: f32[8,64], index: 3, kind: output, shape index: {}]  }
   0x1   :  { %9 = dma.hbm_to_smem %s313_s0, 16, %s260_s12, [#allocation2] }
   0x2   :  { %252 = dma.done.wait [#allocation2], 16 }
   0x3   :  { %253 = vsyncadd [#allocation2], 4294967280 }
   0x4   :  { %11 = sfence }
   0x5   :  { %12 = vsyncpa [#allocation5], 0 }
   0x6   :  { %13 = vsyncpa [#allocation8], 0 }
   0x7   :  { %14 = vsyncpa [#allocation6], 0  ;;  %s261_s15 = smov [#allocation4]  }
   0x8   :  { %s20_s16 = sshll.u32 %s261_s15, 4  ;;  %s21_s16 = int_to_ptr.vmem [resolvable:$true] %s20_s16 }
   0x9   :  { %s200_s17 = scalar_lea.vmem %s21_s16, 1024  ;;  %p205_p1 = scmp.lt.s32.totalorder %s21_s16, %s21_s16 }
   0xa   :  { %p201_p0 = scmp.ne.s32.totalorder %s21_s16, %s200_s17  ;;  %p206_p2 = scmp.lt.s32.totalorder %s200_s17, %s200_s17 }
   0xc   :  { %p207_p3 = por %p206_p2, %p205_p1 }
   0xe   :  { %p208_p4 = pnand %p207_p3, %p201_p0 }
  0x10   :  { %211 = shalt.err (!%p208_p4)
}
  0x11   :  { %s262_s18 = smov 64   ;;  %s263_s19 = smov 4  }
  0x12   :  { %26 = dma.hbm_to_vmem [thread:$0]  %s314_s1, 1024, %s21_s16, [#allocation5], %s262_s18, %s262_s18, %s263_s19  }
  0x13   :  { %s264_s21 = smov [#allocation7]  }
  0x14   :  { %s33_s22 = sshll.u32 %s264_s21, 4  ;;  %s34_s22 = int_to_ptr.vmem [resolvable:$true] %s33_s22 }
  0x15   :  { %s220_s23 = scalar_lea.vmem %s34_s22, 128  ;;  %p225_p6 = scmp.lt.s32.totalorder %s34_s22, %s34_s22 }
  0x16   :  { %p221_p5 = scmp.ne.s32.totalorder %s34_s22, %s220_s23  ;;  %p226_p7 = scmp.lt.s32.totalorder %s220_s23, %s220_s23 }
  0x18   :  { %p227_p8 = por %p226_p7, %p225_p6 }
  0x1a   :  { %p228_p9 = pnand %p227_p8, %p221_p5 }
  0x1c   :  { %231 = shalt.err (!%p228_p9)
}
  0x1d   :  { %36 = dma.hbm_to_vmem [thread:$0]  %s315_s2, 128, %s34_s22, [#allocation8]  }
  0x1e   :  { %254 = dma.done.wait [#allocation5], 1024  }
  0x1f   :  { %255 = vsyncadd [#allocation5], 4294966272 }
  0x20   :  { %256 = dma.done.wait [#allocation8], 128  }
  0x21   :  { %257 = vsyncadd [#allocation8], 4294967168  ;;  %s43_s26 = sld [smem:[#allocation3]]  ;;  %v44_v0 = vld [vmem:[#allocation4] sm:$0xff]   ;;  %v66_v3 = vld [vmem:[#allocation4 + $0x8] sm:$0xff]   ;;  %s265_s5 = smov [#allocation9]  }
  0x22   :  { %s165_s1 = sld [smem:[#allocation3 + $0x1]]  ;;  %v49_v2 = vld [vmem:[#allocation4 + $0x20] sm:$0xff]   ;;  %v45_v4 = vunpack.c.l.bf16 %v44_v0  ;;  %v55_v6 = vunpack.c.h.bf16 %v44_v0  ;;  %v72_v8 = vld [vmem:[#allocation4 + $0x28] sm:$0xff]   ;;  %v67_v10 = vunpack.c.l.bf16 %v66_v3  ;;  %v90_v13 = vld [vmem:[#allocation4 + $0x10] sm:$0xff]   ;;  %v79_v17 = vunpack.c.h.bf16 %v66_v3  ;;  %s155_s6 = sshll.u32 %s265_s5, 4  ;;  %s156_s6 = int_to_ptr.vmem [resolvable:$true] %s155_s6 }
  0x23   :  { %s166_s27 = sld [smem:[#allocation3 + $0x2]]  ;;  %v50_v5 = vunpack.c.l.bf16 %v49_v2  ;;  %v61_v9 = vunpack.c.h.bf16 %v49_v2  ;;  %v73_v12 = vunpack.c.l.bf16 %v72_v8  ;;  %v96_v18 = vld [vmem:[#allocation4 + $0x30] sm:$0xff]   ;;  %v85_v25 = vunpack.c.h.bf16 %v72_v8  ;;  %v114_v31 = vld [vmem:[#allocation4 + $0x18] sm:$0xff]   ;;  %v140_v0 = vld [vmem:[#allocation7] sm:$0xff]  ;;  %s232_s7 = scalar_lea.vmem %s156_s6, 128 }
  0x24   :  { %s295_s28 = sld [smem:[#allocation3 + $0x3]]  ;;  %v91_v26 = vunpack.c.l.bf16 %v90_v13  ;;  %v97_v29 = vunpack.c.l.bf16 %v96_v18  ;;  %v103_v30 = vunpack.c.h.bf16 %v90_v13  ;;  %v120_v32 = vld [vmem:[#allocation4 + $0x38] sm:$0xff]   ;;  %v109_v40 = vunpack.c.h.bf16 %v96_v18  ;;  %p233_p10 = scmp.ne.s32.totalorder %s156_s6, %s232_s7 }
  0x25   :  { %s297_s29 = sld [smem:[#allocation3 + $0x4]]  ;;  %v115_v42 = vunpack.c.l.bf16 %v114_v31  ;;  %v121_v44 = vunpack.c.l.bf16 %v120_v32  ;;  %v127_v47 = vunpack.c.h.bf16 %v114_v31  ;;  %v133_v51 = vunpack.c.h.bf16 %v120_v32  ;;  %p237_p11 = scmp.lt.s32.totalorder %s156_s6, %s156_s6 }
  0x26   :  { %s299_s30 = sld [smem:[#allocation3 + $0x5]]  ;;  %vm147_vm0 = vcmask 523264   ;;  %p238_p12 = scmp.lt.s32.totalorder %s232_s7, %s232_s7 }
  0x27   :  { %v46_v1 = vstv %s43_s26  ;;  %s301_s2 = sld [smem:[#allocation3 + $0x6]] }
  0x28   :  { %v56_v7 = vstv %s165_s1  ;;  %s303_s4 = sld [smem:[#allocation3 + $0x7]]  ;;  %v47_v14 = vmul.f32 %v46_v1, %v45_v4  ;;  %v51_v15 = vmul.f32 %v50_v5, %v46_v1  ;;  %v142_v1 = vsub.f32 1.0, %v140_v0  ;;  %p239_p13 = por %p238_p12, %p237_p11 }
  0x29   :  { %v68_v11 = vstv %s166_s27  ;;  %v57_v16 = vmul.f32 %v56_v7, %v55_v6  ;;  %v62_v19 = vmul.f32 %v61_v9, %v56_v7 }
  0x2a   :  { %v69_v20 = vmul.f32 %v68_v11, %v67_v10  ;;  %v74_v21 = vmul.f32 %v73_v12, %v68_v11  ;;  %v80_v22 = vstv %s295_s28  ;;  %p240_p0 = pnand %p239_p13, %p233_p10 }
  0x2b   :  { %v58_v23 = vadd.f32 %v57_v16, %v47_v14  ;;  %v81_v24 = vmul.f32 %v80_v22, %v79_v17  ;;  %v63_v27 = vadd.f32 %v62_v19, %v51_v15  ;;  %v92_v28 = vstv %s297_s29 }
  0x2c   :  { %v86_v34 = vmul.f32 %v85_v25, %v80_v22  ;;  %v93_v35 = vmul.f32 %v92_v28, %v91_v26  ;;  %v104_v36 = vstv %s299_s30  ;;  %v98_v38 = vmul.f32 %v97_v29, %v92_v28 }
  0x2d   :  { %v70_v33 = vadd.f32 %v69_v20, %v58_v23  ;;  %v75_v37 = vadd.f32 %v74_v21, %v63_v27  ;;  %v105_v39 = vmul.f32 %v104_v36, %v103_v30  ;;  %v116_v43 = vstv %s301_s2 }
  0x2e   :  { %v110_v46 = vmul.f32 %v109_v40, %v104_v36  ;;  %v128_v48 = vstv %s303_s4  ;;  %v117_v50 = vmul.f32 %v116_v43, %v115_v42  ;;  %v122_v53 = vmul.f32 %v121_v44, %v116_v43 }
  0x2f   :  { %v82_v41 = vadd.f32 %v81_v24, %v70_v33  ;;  %v87_v45 = vadd.f32 %v86_v34, %v75_v37  ;;  %v129_v55 = vmul.f32 %v128_v48, %v127_v47  ;;  %v134_v57 = vmul.f32 %v133_v51, %v128_v48 }
  0x31   :  { %v94_v49 = vadd.f32 %v93_v35, %v82_v41  ;;  %v99_v52 = vadd.f32 %v98_v38, %v87_v45 }
  0x33   :  { %v106_v54 = vadd.f32 %v105_v39, %v94_v49  ;;  %v111_v56 = vadd.f32 %v110_v46, %v99_v52 }
  0x35   :  { %v118_v58 = vadd.f32 %v117_v50, %v106_v54  ;;  %v123_v59 = vadd.f32 %v122_v53, %v111_v56 }
  0x37   :  { %v130_v60 = vadd.f32 %v129_v55, %v118_v58  ;;  %v135_v61 = vadd.f32 %v134_v57, %v123_v59 }
  0x39   :  { %v136_v62 = vmul.f32 1.442695, %v130_v60  ;;  %v138_v63 = vmul.f32 1.442695, %v135_v61 }
  0x3b   :  { %178 = vpow2.f32 %v136_v62 }
  0x3c   :  { %180 = vpow2.f32 %v138_v63 }
  0x48   :  { %v179_v2 = vpop.eup %178 }
  0x49   :  { %v181_v3 = vpop.eup %180  ;;  %v143_v4 = vmul.f32 %v179_v2, %v142_v1 }
  0x4a   :  { %v141_v5 = vmul.f32 %v181_v3, %v140_v0 }
  0x4c   :  { %v144_v6 = vadd.f32 %v143_v4, %v141_v5 }
  0x4e   :  { %182 = vrcp.f32 %v144_v6 }
  0x5b   :  { %v183_v7 = vpop.eup %182 }
  0x5c   :  { %v146_v8 = vmul.f32 %v183_v7, %v141_v5 }
  0x5e   :  { %148 = vst.msk [vmem:[#allocation9] sm:$0xff] %vm147_vm0, %v146_v8 }
  0x5f   :  { %243 = shalt.err (!%p240_p0)
}
  0x60   :  { %158 = dma.vmem_to_hbm [thread:$0]  %s156_s6, 128, %s316_s3, [#allocation6]  }
  0x61   :  { %258 = dma.done.wait [#allocation6], 128  }
  0x62   :  { %259 = vsyncadd [#allocation6], 4294967168 }
  0x63   :  { %162 = vsyncpa [#allocation5], 1 }
  0x64   :  { %163 = vsyncpa [#allocation8], 1 }
  0x65   :  { %164 = vsyncpa [#allocation6], 1 }

</bundles_post_ra>
